<compile_context>
chip_gen: v7x
topology: tpu7x:2x2x1
jax: 0.10.0
libtpu: 0.0.40
codegen_flags: <defaults>
</compile_context>

<pallas_src>
import jax
import jax.numpy as jnp
from jax.experimental import pallas as pl
from jax.experimental.pallas import tpu as pltpu

BN_EPS = 1e-5


def _mine_kernel(x_ref, w2t_ref, tbl_ref, out_ref):
    k_in = x_ref.shape[1]                      # input_size (static, tiny)

    x = x_ref[...]                             # (B, k_in)
    w2t = w2t_ref[...]                         # (H, H), contracted dim first
    tbl = tbl_ref[...]                         # (k_in + 3, H) packed params

    # ---- fc1 on the VPU (K = input_size is tiny; MXU would be <2% utilized).
    # b1 omitted: it is cancelled exactly by the batch-mean subtraction below.
    h1 = x[:, 0:1] * tbl[0:1, :]               # (B, H)
    for k in range(1, k_in):
        h1 = h1 + x[:, k:k + 1] * tbl[k:k + 1, :]

    # ---- BatchNorm1d, training mode: batch mean, biased var, gamma=1, beta=0.
    mean = jnp.mean(h1, axis=0, keepdims=True)              # (1, H)
    c = h1 - mean
    var = jnp.mean(c * c, axis=0, keepdims=True)            # (1, H)
    h1n = jnp.maximum(c * jax.lax.rsqrt(var + BN_EPS), 0.0)  # relu

    # ---- fc2 on the MXU (+ bias, relu).
    b2 = tbl[k_in:k_in + 1, :]                               # (1, H)
    h2 = jnp.dot(h1n, w2t, preferred_element_type=jnp.float32) + b2
    h2 = jnp.maximum(h2, 0.0)                                # (B, H)

    # ---- fc3 as VPU multiply + cross-lane reduce (output width N = 1).
    w3_row = tbl[k_in + 1:k_in + 2, :]                       # (1, H)
    b3 = tbl[k_in + 2:k_in + 3, 0:1]                         # (1, 1)
    y = jnp.sum(h2 * w3_row, axis=-1, keepdims=True) + b3    # (B, 1)
    out_ref[...] = y.astype(out_ref.dtype)


def mine_forward(x, w1, b1, w2, b2, w3, b3):
    """Forward pass of `Mine`.

    `b1` is accepted for API parity with the torch module but is mathematically
    redundant (BatchNorm subtracts the batch mean, cancelling any per-feature
    additive bias exactly), so it is never sent to the kernel.
    """
    del b1
    batch = x.shape[0]
    hidden = w1.shape[0]

    # Pre-transpose once in XLA (pure layout change) -> no in-kernel transposes.
    w1t = jnp.transpose(w1).astype(jnp.float32)              # (input_size, H)
    w2t = jnp.transpose(w2).astype(jnp.float32)              # (H, H)

    # Pack all tiny per-feature vectors into one table -> one DMA instead of 4.
    tbl = jnp.concatenate(
        [
            w1t,                                                        # rows 0..k_in-1
            jnp.reshape(b2, (1, hidden)),                               # row k_in
            jnp.reshape(w3, (1, hidden)),                               # row k_in+1
            jnp.broadcast_to(jnp.reshape(b3, (1, 1)), (1, hidden)),     # row k_in+2
        ],
        axis=0,
    ).astype(jnp.float32)

    vmem = pl.BlockSpec(memory_space=pltpu.MemorySpace.VMEM)
    return pl.pallas_call(
        _mine_kernel,
        out_shape=jax.ShapeDtypeStruct((batch, 1), jnp.float32),
        in_specs=[vmem, vmem, vmem],
        out_specs=vmem,
    )(x.astype(jnp.float32), w2t, tbl)


def init_params(key, input_size=2, hidden_size=32):
    k1, k2, k3 = jax.random.split(key, 3)
    # torch.nn.init.normal_(weight, std=0.01); bias = 0
    w1 = 0.01 * jax.random.normal(k1, (hidden_size, input_size), jnp.float32)
    b1 = jnp.zeros((hidden_size,), jnp.float32)
    w2 = 0.01 * jax.random.normal(k2, (hidden_size, hidden_size), jnp.float32)
    b2 = jnp.zeros((hidden_size,), jnp.float32)
    w3 = 0.01 * jax.random.normal(k3, (1, hidden_size), jnp.float32)
    b3 = jnp.zeros((1,), jnp.float32)
    return w1, b1, w2, b2, w3, b3


def reference_forward(x, w1, b1, w2, b2, w3, b3):
    h1 = x @ w1.T + b1
    mean = jnp.mean(h1, axis=0, keepdims=True)
    var = jnp.mean((h1 - mean) ** 2, axis=0, keepdims=True)
    h1 = jnp.maximum((h1 - mean) * jax.lax.rsqrt(var + BN_EPS), 0.0)
    h2 = jnp.maximum(h1 @ w2.T + b2, 0.0)
    return h2 @ w3.T + b3


if __name__ == "__main__":
    key = jax.random.PRNGKey(0)
    kx, kp = jax.random.split(key)

    batch, input_size, hidden_size = 8, 2, 32
    x = jax.random.normal(kx, (batch, input_size), jnp.float32)
    params = init_params(kp, input_size=input_size, hidden_size=hidden_size)

    out = mine_forward(x, *params)
    out = jax.block_until_ready(out)

    ref = reference_forward(x, *params)
    assert out.shape == (batch, 1)
    assert jnp.allclose(out, ref, atol=1e-5, rtol=1e-5)

    print("KERNEL_OK")
</pallas_src>

<mosaic_0001>
module attributes {stable_mosaic.version = 11 : i64} {
  func.func @_mine_kernel(%arg0: memref<8x2xf32, #tpu.memory_space<vmem>>, %arg1: memref<32x32xf32, #tpu.memory_space<vmem>>, %arg2: memref<5x32xf32, #tpu.memory_space<vmem>>, %arg3: memref<8x1xf32, #tpu.memory_space<vmem>>) attributes {dimension_semantics = [], scalar_prefetch = 0 : i64, scratch_operands = 0 : i64, tpu.core_type = #tpu.core_type<tc>} {
    %c0 = arith.constant 0 : index
    %c0_0 = arith.constant 0 : index
    %0 = vector.load %arg0[%c0, %c0_0] : memref<8x2xf32, #tpu.memory_space<vmem>>, vector<8x2xf32>
    %c0_1 = arith.constant 0 : index
    %c0_2 = arith.constant 0 : index
    %1 = vector.load %arg1[%c0_1, %c0_2] : memref<32x32xf32, #tpu.memory_space<vmem>>, vector<32x32xf32>
    %c0_3 = arith.constant 0 : index
    %c0_4 = arith.constant 0 : index
    %2 = vector.load %arg2[%c0_3, %c0_4] : memref<5x32xf32, #tpu.memory_space<vmem>>, vector<5x32xf32>
    %3 = vector.extract_strided_slice %0 {offsets = [0, 0], sizes = [8, 1], strides = [1, 1]} : vector<8x2xf32> to vector<8x1xf32>
    %4 = vector.extract_strided_slice %2 {offsets = [0, 0], sizes = [1, 32], strides = [1, 1]} : vector<5x32xf32> to vector<1x32xf32>
    %5 = vector.broadcast %3 : vector<8x1xf32> to vector<8x32xf32>
    %6 = vector.broadcast %4 : vector<1x32xf32> to vector<8x32xf32>
    %7 = arith.mulf %5, %6 : vector<8x32xf32>
    %8 = vector.extract_strided_slice %0 {offsets = [0, 1], sizes = [8, 1], strides = [1, 1]} : vector<8x2xf32> to vector<8x1xf32>
    %9 = vector.extract_strided_slice %2 {offsets = [1, 0], sizes = [1, 32], strides = [1, 1]} : vector<5x32xf32> to vector<1x32xf32>
    %10 = vector.broadcast %8 : vector<8x1xf32> to vector<8x32xf32>
    %11 = vector.broadcast %9 : vector<1x32xf32> to vector<8x32xf32>
    %12 = arith.mulf %10, %11 : vector<8x32xf32>
    %13 = arith.addf %7, %12 : vector<8x32xf32>
    %cst = arith.constant dense<0.000000e+00> : vector<32xf32>
    %14 = vector.multi_reduction <add>, %13, %cst [0] : vector<8x32xf32> to vector<32xf32>
    %15 = vector.shape_cast %14 : vector<32xf32> to vector<1x32xf32>
    %cst_5 = arith.constant 8.000000e+00 : f32
    %16 = vector.broadcast %cst_5 : f32 to vector<1x32xf32>
    %17 = arith.divf %15, %16 : vector<1x32xf32>
    %18 = vector.broadcast %17 : vector<1x32xf32> to vector<8x32xf32>
    %19 = arith.subf %13, %18 : vector<8x32xf32>
    %20 = arith.mulf %19, %19 : vector<8x32xf32>
    %cst_6 = arith.constant dense<0.000000e+00> : vector<32xf32>
    %21 = vector.multi_reduction <add>, %20, %cst_6 [0] : vector<8x32xf32> to vector<32xf32>
    %22 = vector.shape_cast %21 : vector<32xf32> to vector<1x32xf32>
    %cst_7 = arith.constant 8.000000e+00 : f32
    %23 = vector.broadcast %cst_7 : f32 to vector<1x32xf32>
    %24 = arith.divf %22, %23 : vector<1x32xf32>
    %cst_8 = arith.constant 9.99999974E-6 : f32
    %25 = vector.broadcast %cst_8 : f32 to vector<1x32xf32>
    %26 = arith.addf %24, %25 : vector<1x32xf32>
    %27 = math.rsqrt %26 : vector<1x32xf32>
    %28 = vector.broadcast %27 : vector<1x32xf32> to vector<8x32xf32>
    %29 = arith.mulf %19, %28 : vector<8x32xf32>
    %cst_9 = arith.constant 0.000000e+00 : f32
    %30 = vector.broadcast %cst_9 : f32 to vector<8x32xf32>
    %31 = arith.maximumf %29, %30 : vector<8x32xf32>
    %32 = vector.extract_strided_slice %2 {offsets = [2, 0], sizes = [1, 32], strides = [1, 1]} : vector<5x32xf32> to vector<1x32xf32>
    %cst_10 = arith.constant dense<0.000000e+00> : vector<8x32xf32>
    %33 = tpu.matmul %31, %1, %cst_10 {dimension_numbers = #tpu.dot_dimension_numbers<[1], [0], [0], [1], [0, 0, 1, 1], [], []>} : vector<8x32xf32>, vector<32x32xf32>, vector<8x32xf32> -> vector<8x32xf32>
    %34 = vector.broadcast %32 : vector<1x32xf32> to vector<8x32xf32>
    %35 = arith.addf %33, %34 : vector<8x32xf32>
    %cst_11 = arith.constant 0.000000e+00 : f32
    %36 = vector.broadcast %cst_11 : f32 to vector<8x32xf32>
    %37 = arith.maximumf %35, %36 : vector<8x32xf32>
    %38 = vector.extract_strided_slice %2 {offsets = [3, 0], sizes = [1, 32], strides = [1, 1]} : vector<5x32xf32> to vector<1x32xf32>
    %39 = vector.extract_strided_slice %2 {offsets = [4, 0], sizes = [1, 1], strides = [1, 1]} : vector<5x32xf32> to vector<1x1xf32>
    %40 = vector.broadcast %38 : vector<1x32xf32> to vector<8x32xf32>
    %41 = arith.mulf %37, %40 : vector<8x32xf32>
    %cst_12 = arith.constant dense<0.000000e+00> : vector<8xf32>
    %42 = vector.multi_reduction <add>, %41, %cst_12 [1] : vector<8x32xf32> to vector<8xf32>
    %43 = vector.shape_cast %42 : vector<8xf32> to vector<8x1xf32>
    %44 = vector.broadcast %39 : vector<1x1xf32> to vector<8x1xf32>
    %45 = arith.addf %43, %44 : vector<8x1xf32>
    %c0_13 = arith.constant 0 : index
    %c0_14 = arith.constant 0 : index
    %46 = vector.load %arg3[%c0_13, %c0_14] : memref<8x1xf32, #tpu.memory_space<vmem>>, vector<8x1xf32>
    tpu.vector_store %arg3[%c0_13, %c0_14], %45 {strides = array<i32>} : memref<8x1xf32, #tpu.memory_space<vmem>>, vector<8x1xf32>,
    return
  }
}

</mosaic_0001>

<bundles_post_ra>
// kernel: tpu_custom_call.1
= control target key start
LH: loop header
LB: loop body
LE: loop exit
PB: predicated region body
PF: predicated region fallthrough
CT: control target
= control target key end

     0   :  { %8 = vsyncpa [#allocation3], 0  ;;  %s235_s12 = smov [#allocation2]   ;;  %s288_s0 = inlined_call_operand.vmem [shape: f32[8,2], index: 0, kind: input, shape index: {}]   ;;  %s289_s1 = inlined_call_operand.hbm [shape: f32[32,32], index: 1, kind: input, shape index: {}]   ;;  %s290_s2 = inlined_call_operand.vmem [shape: f32[5,32], index: 2, kind: input, shape index: {}]   ;;  %s291_s3 = inlined_call_operand.vmem [shape: f32[8,1], index: 3, kind: output, shape index: {}]  }
   0x1   :  { %s16_s13 = sshll.u32 %s235_s12, 4  ;;  %s211_s16 = scalar_lea.hbm %s289_s1, 512  ;;  %s17_s13 = int_to_ptr.vmem [resolvable:$true] %s16_s13 }
   0x2   :  { %p212_p0 = scmp.ne.s32.totalorder %s289_s1, %s211_s16  ;;  %p215_p1 = scmp.lt.u32.totalorder %s211_s16, %s289_s1 }
   0x4   :  { %p217_p2 = pnand %p215_p1, %p212_p0 }
   0x6   :  { %220 = shalt.err (!%p217_p2)
}
   0x7   :  { %s221_s21 = scalar_lea.vmem %s17_s13, 512  ;;  %p226_p4 = scmp.lt.s32.totalorder %s17_s13, %s17_s13 }
   0x8   :  { %p222_p3 = scmp.ne.s32.totalorder %s17_s13, %s221_s21  ;;  %p227_p5 = scmp.lt.s32.totalorder %s221_s21, %s221_s21 }
   0xa   :  { %p228_p6 = por %p227_p5, %p226_p4 }
   0xc   :  { %p229_p7 = pnand %p228_p6, %p222_p3 }
   0xe   :  { %232 = shalt.err (!%p229_p7)
}
   0xf   :  { %s236_s22 = smov 128   ;;  %s237_s23 = smov 8  }
  0x10   :  { %22 = dma.hbm_to_vmem [thread:$0]  %s289_s1, 512, %s17_s13, [#allocation3], %s236_s22, %s236_s22, %s237_s23  }
  0x11   :  { %233 = dma.done.wait [#allocation3], 512  }
  0x12   :  { %234 = vsyncadd [#allocation3], 4294966784  ;;  %v238_v0 = vmov 0   ;;  %v28_v1 = vld [vmem:[%s288_s0] sm:$0xff]  ;;  %v239_v2 = vmov 1   ;;  %v29_v3 = vld [vmem:[#allocation2] sm:$0xff]  ;;  %v39_v11 = vlaneseq }
  0x13   :  { %207 = vset.pattern.permute.xlu0 %v238_v0  ;;  %v30_v4 = vld [vmem:[#allocation2 + $0x8] sm:$0xff]  ;;  %v31_v5 = vld [vmem:[#allocation2 + $0x10] sm:$0xff]  ;;  %v240_v6 = vmov 0.0|0.0   ;;  %v32_v8 = vld [vmem:[#allocation2 + $0x18] sm:$0xff]  ;;  %vm241_vm0 = vmmov 0   ;;  %v242_v9 = vmov 0.0  }
  0x14   :  { %36 = vperm.xlu0 %207, %v28_v1   ;;  %193 = vmatprep.subr.bf16.mxu0 %v240_v6  ;;  %v194_v7 = vpack.c.bf16 %v30_v4, %v29_v3  ;;  %v197_v10 = vpack.c.bf16 %v32_v8, %v31_v5  ;;  %v40_v12 = vshrl.u32 %v39_v11, 7  ;;  %v33_v15 = vld [vmem:[%s290_s2] sm:$0x1f]  ;;  %vm54_vm1 = vcmask 261120  }
  0x15   :  { %190 = vmatprep.mubr.msk.f32.mxu0 %vm241_vm0, %v242_v9  ;;  %vm169_vm2 = vcmask 7168  }
  0x16   :  { %195 = vmatpush3.bf16.msra.mxu0 %v194_v7  ;;  %v41_v13 = vsub.s32 0, %v40_v12  ;;  %v50_v14 = vsub.s32 1, %v40_v12  ;;  %v80_v45 = vsub.s32 2, %v40_v12  ;;  %v158_v47 = vsub.s32 3, %v40_v12 }
  0x17   :  { %196 = vmatprep.subr.bf16.mxu0 %v240_v6  ;;  %v166_v55 = vsub.s32 4, %v40_v12 }
  0x18   :  { %208 = vset.pattern.permute.xlu0 %v239_v2  ;;  %v42_v17 = vrot.slane %v33_v15, %v41_v13  ;;  %v51_v18 = vrot.slane %v33_v15, %v50_v14  ;;  %v81_v46 = vrot.slane %v33_v15, %v80_v45  ;;  %v159_v51 = vrot.slane %v33_v15, %v158_v47 }
  0x19   :  { %45 = vperm.xlu0 %208, %v28_v1   ;;  %v167_v56 = vrot.slane %v33_v15, %v166_v55 }
  0x1a   :  { %198 = vmatpush3.bf16.msra.mxu0 %v197_v10 }
  0x93   :  { %v37_v16 = vpop.permute.xlu0 %36 }
  0x94   :  { %v43_v20 = vmul.f32 %v42_v17, %v37_v16 }
  0x98   :  { %v46_v19 = vpop.permute.xlu0 %45 }
  0x99   :  { %v52_v21 = vmul.f32 %v51_v18, %v46_v19 }
  0x9b   :  { %v53_v22 = vadd.f32 %v52_v21, %v43_v20 }
  0x9d   :  { %v55_v23 = vsel %vm54_vm1, %v53_v22, 0.0 }
  0x9e   :  { %v56_v24 = vrot.slane %v55_v23, 4 }
  0xa0   :  { %v57_v25 = vadd.f32 %v56_v24, %v55_v23 }
  0xa2   :  { %v58_v26 = vrot.slane %v57_v25, 2 }
  0xa4   :  { %v59_v27 = vadd.f32 %v58_v26, %v57_v25 }
  0xa6   :  { %v60_v28 = vrot.slane %v59_v27, 1 }
  0xa8   :  { %v61_v29 = vadd.f32 %v60_v28, %v59_v27 }
  0xaa   :  { %v63_v30 = vmul.f32 0.125, %v61_v29 }
  0xac   :  { %v64_v31 = vsub.f32 %v53_v22, %v63_v30 }
  0xae   :  { %v65_v32 = vmul.f32 %v64_v31, %v64_v31 }
  0xb0   :  { %v66_v33 = vsel %vm54_vm1, %v65_v32, 0.0 }
  0xb1   :  { %v67_v34 = vrot.slane %v66_v33, 4 }
  0xb3   :  { %v68_v35 = vadd.f32 %v67_v34, %v66_v33 }
  0xb5   :  { %v69_v36 = vrot.slane %v68_v35, 2 }
  0xb7   :  { %v70_v37 = vadd.f32 %v69_v36, %v68_v35 }
  0xb9   :  { %v71_v38 = vrot.slane %v70_v37, 1 }
  0xbb   :  { %v72_v39 = vadd.f32 %v71_v38, %v70_v37 }
  0xbd   :  { %v73_v40 = vmul.f32 0.125, %v72_v39 }
  0xbf   :  { %v74_v41 = vadd.f32 1e-05, %v73_v40 }
  0xc1   :  { %209 = vrsqrt.f32 %v74_v41 }
  0xcb   :  { %v210_v42 = vpop.eup %209 }
  0xcc   :  { %v76_v43 = vmul.f32 %v210_v42, %v64_v31 }
  0xce   :  { %v77_v44 = vmax.f32 %v76_v43, 0.0 }
  0xd0   :  { %191 = vmatmul.mubr.msk.f32.vlgmr.msra.gmra.mrb[0].mxu0 %vm54_vm1, %v77_v44 }
 0x1a3   :  { %v151_v48 = vpop.f32.mrb[0].mxu0 }
 0x1a4   :  { %v152_v49 = vadd.f32 %v151_v48, %v81_v46  ;;  %v192_v50 = vpop.f32.mrb[1].mxu0 }
 0x1a6   :  { %v155_v52 = vmax.f32 %v152_v49, 0.0 }
 0x1a8   :  { %v160_v53 = vmul.f32 %v159_v51, %v155_v52 }
 0x1aa   :  { %v161_v54 = vsel %vm54_vm1, %v160_v53, 0.0 }
 0x1ab   :  { %162 = vadd.xlane.f32.xlu1 %v161_v54 }
 0x238   :  { %v163_v57 = vpop.xlane.xlu1 %162 }
 0x239   :  { %v168_v58 = vadd.f32 %v167_v56, %v163_v57 }
 0x23b   :  { %170 = vst.msk [vmem:[%s291_s3] sm:$0xff] %vm169_vm2, %v168_v58 }
 0x23c   :  { %175 = vsyncpa [#allocation3], 1 }

</bundles_post_ra>
